<compile_context>
chip_gen: v7x
topology: tpu7x:2x2x1
jax: 0.10.0
libtpu: 0.0.40
codegen_flags: <defaults>
</compile_context>

<pallas_src>
import math

import jax
import jax.numpy as jnp
from jax.experimental import pallas as pl
from jax.experimental.pallas import tpu as pltpu

_MIB = 1024 * 1024


def build_pe_table(d_model: int, max_len: int) -> jnp.ndarray:
    """Deterministic positional-encoding buffer, identical to the PyTorch init. (max_len, 1, D)."""
    position = jnp.arange(max_len, dtype=jnp.float32)[:, None]                 # (max_len, 1)
    div_term = jnp.exp(
        jnp.arange(0, d_model, 2, dtype=jnp.float32) * -(math.log(10000.0) / d_model)
    )                                                                           # (D//2,)
    ang = position * div_term                                                   # (max_len, D//2)
    pe = jnp.zeros((max_len, d_model), dtype=jnp.float32)
    pe = pe.at[:, 0::2].set(jnp.sin(ang))
    pe = pe.at[:, 1::2].set(jnp.cos(ang))
    return pe[:, None, :]                                                       # (max_len, 1, D)


def prepare_pe(pe: jnp.ndarray, batch: int, dtype) -> jnp.ndarray:
    """Init-time (once per model / batch shape) preparation of the pe buffer:
      * cast to the activation dtype (halves pe DMA bytes for bf16, removes in-kernel cast),
      * for small batch (< 8) pre-broadcast over batch and flatten to (max_len*batch, d_model)
        so kernel tiles are sublane-dense (extra pe HBM read is negligible for small batch)."""
    pe = pe.astype(dtype)
    if batch < 8:
        max_len, _, d = pe.shape
        pe = jnp.broadcast_to(pe, (max_len, batch, d)).reshape(max_len * batch, d)
    return pe


def _pe_add_kernel(x_ref, pe_ref, o_ref):
    # Works for both layouts:
    #   2D: x (tile_rows, D) + pe (tile_rows, D)
    #   3D: x (tile_s, B, D) + pe (tile_s, 1, D)   (sublane broadcast over batch, VPU-cheap)
    o_ref[...] = x_ref[...] + pe_ref[...]


def _vmem_limit_bytes() -> int:
    """Scoped-VMEM limit per generation: 3/4 of physical, capped at 96 MiB.
    v7x (64 MiB/TC) -> 48 MiB; v5e/v6e (128 MiB) -> 96 MiB."""
    try:
        phys = int(getattr(pltpu.get_tpu_info(), "vmem_capacity_bytes", 64 * _MIB))
    except Exception:
        phys = 64 * _MIB  # assume the smallest per-core VMEM (v7x) if the query is unavailable
    return min(phys * 3 // 4, 96 * _MIB)


def _choose_tile(total: int, unit_bytes: int, vmem_limit: int,
                 sublane_align: int = 1, min_steps: int = 4) -> int:
    """Largest tile (in units of the tiled leading axis) such that the double-buffered working
    set ~= 2 * (x_tile + out_tile + pe_tile) <= ~6 * x_tile stays ~25% under the scoped limit."""
    budget = (vmem_limit * 3 // 4) // 6
    tile = max(1, budget // max(1, unit_bytes))
    # Keep >= min_steps grid steps when there is enough work, so the "parallel" grid axis can be
    # sharded across v7x's 2 TensorCores (no effect on single-TC v5e/v6e, and skipped for tiny
    # problems where per-step overhead would dominate).
    if total * unit_bytes > 4 * _MIB:
        tile = min(tile, pl.cdiv(total, min_steps))
    tile = min(tile, total)
    if sublane_align > 1 and tile < total:
        # Tiled axis maps to sublanes in the flattened layout: keep it 8-aligned (dense vst).
        tile = (tile // sublane_align) * sublane_align if tile >= sublane_align else total
    return max(tile, 1)


def positional_encoding_forward(x: jnp.ndarray, pe: jnp.ndarray) -> jnp.ndarray:
    """x: (S, B, D).  pe: output of prepare_pe() — either (max_len*B, D) (small-batch flattened
    form) or (max_len, 1, D) with max_len >= S.  Returns x + pe[:S] (eval-mode dropout = identity).

    For the in-place HBM alias (input_output_aliases) to avoid a defensive copy, callers should
    donate x at their jit boundary: jax.jit(positional_encoding_forward, donate_argnums=0)."""
    S, B, D = x.shape
    itemsize = x.dtype.itemsize
    vmem_limit = _vmem_limit_bytes()

    pe_read_elems = S * B * D if pe.ndim == 2 else S * D
    cost = pl.CostEstimate(
        flops=S * B * D,
        transcendentals=0,
        bytes_accessed=(2 * S * B * D + pe_read_elems) * itemsize,
    )
    params = pltpu.CompilerParams(
        dimension_semantics=("parallel",),      # independent tiles; shard across v7x TCs
        vmem_limit_bytes=vmem_limit,
    )

    if pe.ndim == 2:
        # Flattened sublane-dense path (small batch): x rows (s*B + b) line up with pe rows.
        rows = S * B
        x_flat = x.reshape(rows, D)
        tile_rows = _choose_tile(rows, D * itemsize, vmem_limit, sublane_align=8)
        pe_in = pe
        if tile_rows % 8 != 0:
            # tile == full x rows but not 8-aligned: shrink pe so its block equals its full dim.
            pe_in = jax.lax.slice_in_dim(pe, 0, rows)
        out = pl.pallas_call(
            _pe_add_kernel,
            out_shape=jax.ShapeDtypeStruct((rows, D), x.dtype),
            grid=(pl.cdiv(rows, tile_rows),),
            in_specs=[
                pl.BlockSpec((tile_rows, D), lambda i: (i, 0)),
                pl.BlockSpec((tile_rows, D), lambda i: (i, 0)),  # indexes straight into pe buffer
            ],
            out_specs=pl.BlockSpec((tile_rows, D), lambda i: (i, 0)),
            compiler_params=params,
            cost_estimate=cost,
            input_output_aliases={0: 0},        # write the result into x's HBM buffer
        )(x_flat, pe_in)
        return out.reshape(S, B, D)

    # 3D path (batch >= 8): trailing (B, D) are full dims -> dense vregs; pe broadcast in-kernel,
    # so only S*D of the pe buffer is ever read from HBM.
    tile_s = _choose_tile(S, B * D * itemsize, vmem_limit, sublane_align=1)
    return pl.pallas_call(
        _pe_add_kernel,
        out_shape=jax.ShapeDtypeStruct((S, B, D), x.dtype),
        grid=(pl.cdiv(S, tile_s),),
        in_specs=[
            pl.BlockSpec((tile_s, B, D), lambda i: (i, 0, 0)),
            pl.BlockSpec((tile_s, 1, D), lambda i: (i, 0, 0)),
        ],
        out_specs=pl.BlockSpec((tile_s, B, D), lambda i: (i, 0, 0)),
        compiler_params=params,
        cost_estimate=cost,
        input_output_aliases={0: 0},
    )(x, pe)


if __name__ == "__main__":
    d_model = 32
    max_len = 64          # small max_len for the synthetic buffer (module default 5000)
    seq = 8
    batch = 2

    key = jax.random.PRNGKey(0)
    x = jax.random.normal(key, (seq, batch, d_model), dtype=jnp.float32)

    pe_buf = build_pe_table(d_model, max_len)           # (max_len, 1, D), f32 — PyTorch buffer
    pe = prepare_pe(pe_buf, batch, x.dtype)             # init-time: cast + small-batch flatten

    # Reference computed before the (aliased) kernel call.
    ref = x + pe_buf[:seq]

    out = positional_encoding_forward(x, pe)
    out = jax.block_until_ready(out)

    assert out.shape == (seq, batch, d_model)
    assert jnp.allclose(out, ref, atol=1e-6), "mismatch vs reference"

    print("KERNEL_OK")
</pallas_src>

<mosaic_0001>
module attributes {stable_mosaic.version = 11 : i64} {
  func.func @_pe_add_kernel(%arg0: i32, %arg1: memref<16x32xf32, #tpu.memory_space<vmem>>, %arg2: memref<16x32xf32, #tpu.memory_space<vmem>>, %arg3: memref<16x32xf32, #tpu.memory_space<vmem>>) attributes {dimension_semantics = [#tpu.dimension_semantics<parallel>], iteration_bounds = array<i64: 1>, scalar_prefetch = 0 : i64, scratch_operands = 0 : i64, tpu.core_type = #tpu.core_type<tc>, window_params = [{transform_indices = @transform_0, window_bounds = array<i64: 16, 32>}, {transform_indices = @transform_1, window_bounds = array<i64: 16, 32>}, {transform_indices = @transform_2, window_bounds = array<i64: 16, 32>}]} {
    %c0 = arith.constant 0 : index
    %c0_0 = arith.constant 0 : index
    %0 = vector.load %arg1[%c0, %c0_0] : memref<16x32xf32, #tpu.memory_space<vmem>>, vector<16x32xf32>
    %c0_1 = arith.constant 0 : index
    %c0_2 = arith.constant 0 : index
    %1 = vector.load %arg2[%c0_1, %c0_2] : memref<16x32xf32, #tpu.memory_space<vmem>>, vector<16x32xf32>
    %2 = arith.addf %0, %1 : vector<16x32xf32>
    %c0_3 = arith.constant 0 : index
    %c0_4 = arith.constant 0 : index
    %3 = vector.load %arg3[%c0_3, %c0_4] : memref<16x32xf32, #tpu.memory_space<vmem>>, vector<16x32xf32>
    tpu.vector_store %arg3[%c0_3, %c0_4], %2 {strides = array<i32>} : memref<16x32xf32, #tpu.memory_space<vmem>>, vector<16x32xf32>,
    return
  }
  func.func @transform_0(%arg0: i32) -> (i32, i32) {
    %c0_i32 = arith.constant 0 : i32
    %c0_i32_0 = arith.constant 0 : i32
    return %arg0, %c0_i32 : i32, i32
  }
  func.func @transform_1(%arg0: i32) -> (i32, i32) {
    %c0_i32 = arith.constant 0 : i32
    %c0_i32_0 = arith.constant 0 : i32
    return %arg0, %c0_i32 : i32, i32
  }
  func.func @transform_2(%arg0: i32) -> (i32, i32) {
    %c0_i32 = arith.constant 0 : i32
    %c0_i32_0 = arith.constant 0 : i32
    return %arg0, %c0_i32 : i32, i32
  }
}

</mosaic_0001>

<bundles_post_ra>
// kernel: tpu_custom_call.1
= control target key start
LH: loop header
LB: loop body
LE: loop exit
PB: predicated region body
PF: predicated region fallthrough
CT: control target
= control target key end

     0   :  { %7 = vsyncpa [#allocation3], 0  ;;  %s159_s0 = inlined_call_operand.hbm [shape: f32[16,32], index: 0, kind: input, shape index: {}, may-alias: {0,2}]   ;;  %s160_s1 = inlined_call_operand.vmem [shape: f32[128,32], index: 1, kind: input, shape index: {}]   ;;  %s161_s2 = inlined_call_operand.hbm [shape: f32[16,32], index: 2, kind: output, shape index: {}, may-alias: {0,2}]  }
   0x1   :  { %8 = vsyncpa [#allocation4], 0  ;;  %s104_s9 = smov [#allocation2]   ;;  %s56_s13 = scalar_lea.hbm %s159_s0, 256 }
   0x2   :  { %s14_s10 = sshll.u32 %s104_s9, 4  ;;  %p57_p0 = scmp.ne.s32.totalorder %s159_s0, %s56_s13  ;;  %s15_s10 = int_to_ptr.vmem [resolvable:$true] %s14_s10 }
   0x3   :  { %p60_p1 = scmp.lt.u32.totalorder %s56_s13, %s159_s0 }
   0x5   :  { %p62_p2 = pnand %p60_p1, %p57_p0 }
   0x7   :  { %65 = shalt.err (!%p62_p2)
}
   0x8   :  { %s66_s18 = scalar_lea.vmem %s15_s10, 256  ;;  %p71_p4 = scmp.lt.s32.totalorder %s15_s10, %s15_s10 }
   0x9   :  { %p67_p3 = scmp.ne.s32.totalorder %s15_s10, %s66_s18  ;;  %p72_p5 = scmp.lt.s32.totalorder %s66_s18, %s66_s18 }
   0xb   :  { %p73_p6 = por %p72_p5, %p71_p4 }
   0xd   :  { %p74_p7 = pnand %p73_p6, %p67_p3 }
   0xf   :  { %77 = shalt.err (!%p74_p7)
}
  0x10   :  { %s105_s19 = smov 128   ;;  %s106_s20 = smov 8  }
  0x11   :  { %20 = dma.hbm_to_vmem [thread:$0]  %s159_s0, 256, %s15_s10, [#allocation3], %s105_s19, %s105_s19, %s106_s20  }
  0x12   :  { %100 = dma.done.wait [#allocation3], 256  }
  0x13   :  { %101 = vsyncadd [#allocation3], 4294967040  ;;  %s107_s23 = smov [#allocation5]   ;;  %v26_v0 = vld [vmem:[#allocation2] sm:$0xff]  ;;  %vm32_vm0 = vcmask 261120   ;;  %v27_v2 = vld [vmem:[#allocation2 + $0x8] sm:$0xff] }
  0x14   :  { %s40_s24 = sshll.u32 %s107_s23, 4  ;;  %v28_v1 = vld [vmem:[%s160_s1] sm:$0xff]  ;;  %v29_v4 = vld [vmem:[%s160_s1 + $0x8] sm:$0xff]  ;;  %s41_s24 = int_to_ptr.vmem [resolvable:$true] %s40_s24 }
  0x15   :  { %v30_v3 = vadd.f32 %v28_v1, %v26_v0  ;;  %v31_v5 = vadd.f32 %v29_v4, %v27_v2  ;;  %s78_s0 = scalar_lea.vmem %s41_s24, 256  ;;  %p83_p9 = scmp.lt.s32.totalorder %s41_s24, %s41_s24 }
  0x16   :  { %p79_p8 = scmp.ne.s32.totalorder %s41_s24, %s78_s0  ;;  %p84_p10 = scmp.lt.s32.totalorder %s78_s0, %s78_s0 }
  0x17   :  { %33 = vst.msk [vmem:[#allocation5] sm:$0xff] %vm32_vm0, %v30_v3  ;;  %34 = vst.msk [vmem:[#allocation5 + $0x8] sm:$0xff] %vm32_vm0, %v31_v5 }
  0x18   :  { %p85_p11 = por %p84_p10, %p83_p9 }
  0x1a   :  { %p86_p12 = pnand %p85_p11, %p79_p8 }
  0x1c   :  { %89 = shalt.err (!%p86_p12)
}
  0x1d   :  { %s90_s3 = scalar_lea.hbm %s161_s2, 256 }
  0x1e   :  { %p91_p13 = scmp.ne.s32.totalorder %s161_s2, %s90_s3  ;;  %p94_p0 = scmp.lt.u32.totalorder %s90_s3, %s161_s2 }
  0x20   :  { %p96_p1 = pnand %p94_p0, %p91_p13 }
  0x22   :  { %99 = shalt.err (!%p96_p1)
}
  0x23   :  { %46 = dma.vmem_to_hbm [thread:$0]  %s41_s24, 256, %s161_s2, [#allocation4], %s105_s19, %s105_s19, %s106_s20  }
  0x24   :  { %102 = dma.done.wait [#allocation4], 256  }
  0x25   :  { %103 = vsyncadd [#allocation4], 4294967040 }
  0x26   :  { %50 = vsyncpa [#allocation3], 1 }
  0x27   :  { %51 = vsyncpa [#allocation4], 1 }

</bundles_post_ra>
